<compile_context>
chip_gen: v7x
topology: tpu7x:2x2x1
jax: 0.10.0
libtpu: 0.0.40
codegen_flags: <defaults>
</compile_context>

<pallas_src>
import jax
import jax.numpy as jnp
from jax.experimental import pallas as pl
from jax.experimental.pallas import tpu as pltpu

MAX_TM = 1024   # max batch rows per grid step
MAX_TN = 2048   # max feature columns per grid step (lane-dense, multiple of 128)


# ----------------------------------------------------------------------------
# Pallas kernel: one (TM, TN) tile of the affine transform
# ----------------------------------------------------------------------------
def affine_kernel(x_ref, p_ref, out_ref):
    # p_ref: (2, TN) -> row 0 = scale, row 1 = shift (broadcast over batch/sublanes)
    out_ref[...] = x_ref[...] * p_ref[0:1, :] + p_ref[1:2, :]


# ----------------------------------------------------------------------------
# Tile-size selection (generation-aware, pad-free)
# ----------------------------------------------------------------------------
def _choose_tm(B):
    """Largest batch tile <= MAX_TM dividing B, preferring >= 2 grid steps (v7x megacore)."""
    candidates = (1024, 512, 256, 128, 64, 32, 16, 8)
    for tm in candidates:
        if B % tm == 0 and B // tm >= 2:
            return tm
    for tm in candidates:
        if B % tm == 0:
            return tm
    # Ragged batch: multiple-of-8 tile (or full dim); Pallas masks the partial block.
    return MAX_TM if B > MAX_TM else B


def _choose_tn(F):
    """Feature tile: whole F when small, else the largest lane-dense divisor."""
    if F <= MAX_TN:
        return F
    for tn in (2048, 1024, 512, 256, 128):
        if F % tn == 0:
            return tn
    return F  # non-multiple-of-128 feature count: full-dim block is always legal


# ----------------------------------------------------------------------------
# Wrapper
# ----------------------------------------------------------------------------
def pack_params(scale, shift, features):
    """Broadcast scalar-or-vector scale/shift to (F,) and pack into one (2, F) array."""
    scale = jnp.broadcast_to(jnp.asarray(scale, jnp.float32), (features,))
    shift = jnp.broadcast_to(jnp.asarray(shift, jnp.float32), (features,))
    return jnp.stack([scale, shift], axis=0)   # (2, F)


@jax.jit
def affine_forward(x, params):
    """x: (B, F) float32; params: (2, F) packed [scale; shift].

    Returns (outputs (B, F), logabsdet (B,)) matching AffineTransform.forward.
    """
    B, F = x.shape
    tm = _choose_tm(B)
    tn = _choose_tn(F)
    grid = (pl.cdiv(B, tm), pl.cdiv(F, tn))

    out = pl.pallas_call(
        affine_kernel,
        out_shape=jax.ShapeDtypeStruct((B, F), jnp.float32),
        grid=grid,
        in_specs=[
            pl.BlockSpec((tm, tn), lambda i, j: (i, j)),   # x tile streams over batch/features
            pl.BlockSpec((2, tn), lambda i, j: (0, j)),    # params: constant over batch -> VMEM-resident
        ],
        out_specs=pl.BlockSpec((tm, tn), lambda i, j: (i, j)),
        compiler_params=pltpu.CompilerParams(
            dimension_semantics=("parallel", "parallel")),  # shards tiles across TCs on v7x
        cost_estimate=pl.CostEstimate(
            flops=2 * B * F, transcendentals=0, bytes_accessed=2 * B * F * 4),
    )(x, params)

    # logabsdet is a per-call constant: sum over batch_shape of log|scale|.
    # (params[0] is scale pre-broadcast to (F,), so this covers both the scalar-
    # and tensor-scale branches of _batch_logabsdet.)
    lad = jnp.sum(jnp.log(jnp.abs(params[0])))
    logabsdet = jnp.full((B,), lad, dtype=jnp.float32)
    return out, logabsdet


# ----------------------------------------------------------------------------
# Pure-JAX reference mirroring the PyTorch forward exactly
# ----------------------------------------------------------------------------
def ref_forward(x, scale, shift):
    batch_shape = x.shape[1:]
    scale_b = jnp.broadcast_to(jnp.asarray(scale, jnp.float32), batch_shape)
    shift_b = jnp.broadcast_to(jnp.asarray(shift, jnp.float32), batch_shape)
    outputs = x * scale_b + shift_b
    lad = jnp.sum(jnp.log(jnp.abs(scale_b)))
    logabsdet = jnp.full((x.shape[0],), lad, dtype=jnp.float32)
    return outputs, logabsdet


if __name__ == "__main__":
    BATCH = 512
    FEATURES = 128

    key = jax.random.PRNGKey(0)
    kx, ks, kt = jax.random.split(key, 3)
    x = jax.random.normal(kx, (BATCH, FEATURES), dtype=jnp.float32)
    # per-feature scale/shift (exercises the numel>1 branch); scale kept away from 0
    scale = jax.random.uniform(ks, (FEATURES,), jnp.float32, 0.5, 1.5)
    shift = jax.random.normal(kt, (FEATURES,), dtype=jnp.float32)

    params = pack_params(scale, shift, FEATURES)
    outputs, logabsdet = affine_forward(x, params)
    jax.block_until_ready((outputs, logabsdet))

    ref_out, ref_lad = ref_forward(x, scale, shift)
    assert outputs.shape == (BATCH, FEATURES)
    assert logabsdet.shape == (BATCH,)
    assert jnp.allclose(outputs, ref_out, atol=1e-5, rtol=1e-5)
    assert jnp.allclose(logabsdet, ref_lad, atol=1e-5, rtol=1e-5)
    print("KERNEL_OK")
</pallas_src>

<mosaic_0001>
module attributes {stable_mosaic.version = 11 : i64} {
  func.func @affine_kernel(%arg0: i32, %arg1: i32, %arg2: memref<256x128xf32, #tpu.memory_space<vmem>>, %arg3: memref<2x128xf32, #tpu.memory_space<vmem>>, %arg4: memref<256x128xf32, #tpu.memory_space<vmem>>) attributes {dimension_semantics = [#tpu.dimension_semantics<parallel>, #tpu.dimension_semantics<parallel>], iteration_bounds = array<i64: 2, 1>, scalar_prefetch = 0 : i64, scratch_operands = 0 : i64, tpu.core_type = #tpu.core_type<tc>, window_params = [{transform_indices = @transform_0, window_bounds = array<i64: 256, 128>}, {transform_indices = @transform_1, window_bounds = array<i64: 2, 128>}, {transform_indices = @transform_2, window_bounds = array<i64: 256, 128>}]} {
    %c0 = arith.constant 0 : index
    %c0_0 = arith.constant 0 : index
    %0 = vector.load %arg2[%c0, %c0_0] : memref<256x128xf32, #tpu.memory_space<vmem>>, vector<256x128xf32>
    %c0_1 = arith.constant 0 : index
    %c0_2 = arith.constant 0 : index
    %1 = vector.load %arg3[%c0_1, %c0_2] : memref<2x128xf32, #tpu.memory_space<vmem>>, vector<1x128xf32>
    %2 = vector.broadcast %1 : vector<1x128xf32> to vector<256x128xf32>
    %3 = arith.mulf %0, %2 : vector<256x128xf32>
    %c1 = arith.constant 1 : index
    %c0_3 = arith.constant 0 : index
    %4 = vector.load %arg3[%c1, %c0_3] : memref<2x128xf32, #tpu.memory_space<vmem>>, vector<1x128xf32>
    %5 = vector.broadcast %4 : vector<1x128xf32> to vector<256x128xf32>
    %6 = arith.addf %3, %5 : vector<256x128xf32>
    %c0_4 = arith.constant 0 : index
    %c0_5 = arith.constant 0 : index
    %7 = vector.load %arg4[%c0_4, %c0_5] : memref<256x128xf32, #tpu.memory_space<vmem>>, vector<256x128xf32>
    tpu.vector_store %arg4[%c0_4, %c0_5], %6 {strides = array<i32>} : memref<256x128xf32, #tpu.memory_space<vmem>>, vector<256x128xf32>,
    return
  }
  func.func @transform_0(%arg0: i32, %arg1: i32) -> (i32, i32) {
    %c0_i32 = arith.constant 0 : i32
    return %arg0, %arg1 : i32, i32
  }
  func.func @transform_1(%arg0: i32, %arg1: i32) -> (i32, i32) {
    %c0_i32 = arith.constant 0 : i32
    %c0_i32_0 = arith.constant 0 : i32
    return %c0_i32, %arg1 : i32, i32
  }
  func.func @transform_2(%arg0: i32, %arg1: i32) -> (i32, i32) {
    %c0_i32 = arith.constant 0 : i32
    return %arg0, %arg1 : i32, i32
  }
}

</mosaic_0001>

<bundles_post_ra>
// kernel: affine_forward.1
= control target key start
LH: loop header
LB: loop body
LE: loop exit
PB: predicated region body
PF: predicated region fallthrough
CT: control target
= control target key end

     0   :  { %7 = vsyncpa [#allocation3], 0  ;;  %s994_s0 = inlined_call_operand.hbm [shape: f32[512,128], index: 0, kind: input, shape index: {}]   ;;  %s995_s1 = inlined_call_operand.vmem [shape: f32[2,128], index: 1, kind: input, shape index: {}]   ;;  %s996_s2 = inlined_call_operand.hbm [shape: f32[512,128], index: 2, kind: output, shape index: {}]  }
   0x1   :  { %9 = vsyncpa [#allocation3 + $0x1], 0 }
   0x2   :  { %10 = vsyncpa [#allocation4], 0 }
   0x3   :  { %12 = vsyncpa [#allocation4 + $0x1], 0  ;;  %s672_s9 = smov 0   ;;  %s674_s10 = smov 0  }
   0x4   :  { %s676_s11 = smov 0   ;;  %s678_s12 = smov 0  }
   0x5   :  { %s680_s13 = smov 0   ;;  %s682_s14 = smov 0  }
   0x6 LB: > { %s451_s15 = sadd.s32 4294967295, %s649_s14   ;;  %s452_s16 = sadd.s32 4294967294, %s649_s14   ;;  %s649_s14 = sphi %s682_s14, %s18_s14   ;;  %s645_s13 = sphi %s680_s13, %s1011_s13   ;;  %s641_s12 = sphi %s678_s12, %s1010_s12   ;;  %s637_s11 = sphi %s676_s11, %s1009_s11   ;;  %s633_s10 = sphi %s674_s10, %s1008_s10   ;;  %s629_s9 = sphi %s672_s9, %s1007_s9  }
   0x7   : > { %s30_s17 = sadd.s32 1, %s645_s13  ;;  %s39_s18 = sadd.s32 1, %s637_s11 }
   0x8   : > { %p32_p0 = scmp.ge.s32.totalorder %s30_s17, 2  ;;  %p46_p1 = scmp.ne.s32.totalorder %s637_s11, %s633_s10 }
   0x9   : > { %p47_p2 = scmp.eq.s32.totalorder %s649_s14, 0  ;;  %p52_p3 = scmp.ne.s32.totalorder %s633_s10, %s629_s9 }
   0xa   : > { %s1013_s17 = smov (%p32_p0, %s30_s17), 0  ;;  %p53_p5 = scmp.eq.s32.totalorder %s451_s15, 0 }
   0xb   : > { %p713_p4 = por %p47_p2, %p46_p1  ;;  %s34_s20 = ssub.s32 %s645_s13, %s1013_s17 }
   0xc   : > { %p104_p6 = scmp.eq.s32.totalorder %s451_s15, 1  ;;  %p37_p7 = scmp.eq.s32.totalorder %s34_s20, 0 }
   0xd   : > { %p719_p8 = por %p53_p5, %p52_p3  ;;  %p110_p10 = scmp.eq.s32.totalorder %s452_s16, 1 }
   0xe   : > { %p723_p9 = por %p104_p6, %p46_p1  ;;  %p483_p13 = scmp.lt.s32.totalorder %s649_s14, 2 }
   0xf   : > { %s728_s23 = scalar_select %p37_p7, %s637_s11, %s39_s18  }
  0x10   : > { %s1000_s22 = scalar_select %p723_p9, 1, 0 }
  0x11   : > { %p730_p11 = por %p110_p10, %p52_p3  ;;  %s137_s25 = sand.u32 1, %s637_s11  }
  0x12   : > { %s456_s26 = sshll.u32 %s137_s25, 8  ;;  %s469_s27 = sshll.u32 %s645_s13, 12 }
  0x13   : > { %s1001_s24 = scalar_select %p730_p11, 1, 0 }
  0x14   : > { %s741_s30 = scalar_lea.hbm %s994_s0, %s469_s27  ;;  %s141_s3 = scalar_lea.vmem [#allocation2], %s456_s26 }
  0x15   : > { %s149_s4 = sshll.u32 %s141_s3, 4  ;;  %p747_p0 = pnand %p483_p13, %p713_p4  ;;  %s743_s4 = int_to_ptr.vmem [resolvable:$true] %s149_s4 }
  0x16   : > { %s752_s6 = scalar_lea.sflag [#allocation3], %s137_s25  ;;  %s537_s7 = scalar_lea.hbm %s741_s30, 4096 }
  0x17   : > { %p538_p2 = scmp.ne.s32.totalorder %s741_s30, %s537_s7  ;;  %p539_p3 = pneg %p747_p0 }
  0x18   : > { %s542_s16 = scalar_lea.hbm %s994_s0, 8192  ;;  %p543_p4 = scmp.lt.u32.totalorder %s741_s30, %s994_s0 }
  0x19   : > { %p540_p5 = pnand %p539_p3, %p538_p2  ;;  %p544_p7 = scmp.lt.u32.totalorder %s542_s16, %s537_s7 }
  0x1a   : > { %p546_p13 = scmp.lt.u32.totalorder %s537_s7, %s741_s30 }
  0x1b   : > { %p541_p6 = pneg %p540_p5  ;;  %p545_p10 = por %p544_p7, %p543_p4 }
  0x1d   : > { %p547_p12 = por %p546_p13, %p545_p10 }
  0x1f   : > { %p548_p1 = pnand %p547_p12, %p541_p6 }
  0x21   : > { %551 = shalt.err (!%p548_p1)
}
  0x22   : > { %s552_s20 = scalar_lea.vmem %s743_s4, 4096  ;;  %s651_s25 = smov [#allocation2]  }
  0x23   : > { %p553_p2 = scmp.ne.s32.totalorder %s743_s4, %s552_s20  ;;  %s557_s26 = sshll.u32 %s651_s25, 4  ;;  %s558_s26 = int_to_ptr.vmem [resolvable:$false] %s557_s26 }
  0x24   : > { %s559_s27 = scalar_lea.vmem %s558_s26, 8192  ;;  %p560_p9 = scmp.lt.s32.totalorder %s743_s4, %s558_s26 }
  0x25   : > { %p555_p5 = pnand %p553_p2, %p539_p3  ;;  %p561_p4 = scmp.lt.s32.totalorder %s559_s27, %s552_s20 }
  0x27   : > { %p556_p11 = pneg %p555_p5  ;;  %p562_p7 = por %p561_p4, %p560_p9 }
  0x29   : > { %p563_p10 = pnand %p562_p7, %p556_p11 }
  0x2b   : > { %566 = shalt.err (!%p563_p10)
}
  0x2c   : > { %s652_s28 = smov 128   ;;  %s653_s29 = smov 8  }
  0x2d   : > { %478 = dma.hbm_to_vmem [thread:$0]  (!%p747_p0), %s741_s30, 4096, %s743_s4, %s752_s6, %s652_s28, %s652_s28, %s653_s29  }
  0x2e   : > { %p157_p12 = scmp.lt.s32.totalorder %s649_s14, 3  ;;  %p1003_p1 = scmp.ge.s32.totalorder %s649_s14, 1 }
  0x30   : > { %p158_p3 = pnand %p1003_p1, %p157_p12 }
  0x31   : > { %s784_s3 = sand.u32 (!%p158_p3), 1, %s633_s10  }
  0x32   : > { %161 = sbr.rel (%p158_p3) target bundleno = 97 (0x61), region = 28  ;;  %s460_s7 = sshll.u32 (!%p158_p3), %s784_s3, 8 }
  0x33   : > { %s164_s8 = scalar_lea.sflag (!%p158_p3), [#allocation3], %s784_s3  ;;  %s790_s15 = scalar_lea.vmem (!%p158_p3), [#allocation2], %s460_s7 }
  0x39   : > { %620 = dma.done.wait (%p719_p8), %s164_s8, 4096  }
  0x3a   : > { %622 = vsyncadd (%p719_p8), %s164_s8, 4294963200  ;;  %v198_v0 = vld [vmem:[%s790_s15] sm:$0xff]  ;;  %v199_v4 = vld [vmem:[%s790_s15 + $0x8] sm:$0xff]  ;;  %s833_s21 = scalar_lea.vmem [#allocation5], %s460_s7  ;;  %s470_s16 = sshll.u32 %s641_s12, 12 }
  0x3b   : > { %v800_v1 = vld [vmem:[%s995_s1] ss:$0 sm:$0xff]  ;;  %v805_v2 = vld [vmem:[%s995_s1 + $0x1] ss:$0 sm:$0xff]  ;;  %v200_v5 = vld [vmem:[%s790_s15 + $0x10] sm:$0xff]  ;;  %s351_s18 = sshll.u32 %s833_s21, 4  ;;  %s935_s20 = scalar_lea.hbm %s996_s2, %s470_s16  ;;  %s937_s18 = int_to_ptr.vmem [resolvable:$true] %s351_s18 }
  0x3c   : > { %v235_v3 = vmul.f32 %v800_v1, %v198_v0  ;;  %v201_v6 = vld [vmem:[%s790_s15 + $0x18] sm:$0xff]  ;;  %v236_v7 = vmul.f32 %v800_v1, %v199_v4  ;;  %v237_v8 = vmul.f32 %v800_v1, %v200_v5  ;;  %v202_v10 = vld [vmem:[%s790_s15 + $0x20] sm:$0xff]  ;;  %v203_v11 = vld [vmem:[%s790_s15 + $0x28] sm:$0xff]  ;;  %s337_s25 = scalar_lea.sflag [#allocation4], %s784_s3  ;;  %s567_s26 = scalar_lea.vmem %s937_s18, 4096 }
  0x3d   : > { %v238_v9 = vmul.f32 %v800_v1, %v201_v6  ;;  %v204_v12 = vld [vmem:[%s790_s15 + $0x30] sm:$0xff]  ;;  %v239_v14 = vmul.f32 %v800_v1, %v202_v10  ;;  %v240_v15 = vmul.f32 %v800_v1, %v203_v11  ;;  %v205_v17 = vld [vmem:[%s790_s15 + $0x38] sm:$0xff]  ;;  %v206_v18 = vld [vmem:[%s790_s15 + $0x40] sm:$0xff]  ;;  %p568_p8 = scmp.ne.s32.totalorder %s937_s18, %s567_s26  ;;  %p1004_p9 = scmp.ne.s32.totalorder %s1000_s22, 0 }
  0x3e   : > { %v272_v13 = vadd.f32 %v805_v2, %v235_v3  ;;  %v241_v16 = vmul.f32 %v800_v1, %v204_v12  ;;  %v207_v19 = vld [vmem:[%s790_s15 + $0x48] sm:$0xff]  ;;  %v273_v20 = vadd.f32 %v805_v2, %v236_v7  ;;  %v274_v21 = vadd.f32 %v805_v2, %v237_v8  ;;  %v208_v24 = vld [vmem:[%s790_s15 + $0x50] sm:$0xff]  ;;  %v209_v25 = vld [vmem:[%s790_s15 + $0x58] sm:$0xff]  ;;  %s654_s27 = smov [#allocation5]  }
  0x3f   : > { %v275_v22 = vadd.f32 %v805_v2, %v238_v9  ;;  %v242_v23 = vmul.f32 %v800_v1, %v205_v17  ;;  %v210_v26 = vld [vmem:[%s790_s15 + $0x60] sm:$0xff]  ;;  %v276_v27 = vadd.f32 %v805_v2, %v239_v14  ;;  %v277_v28 = vadd.f32 %v805_v2, %v240_v15  ;;  %v211_v31 = vld [vmem:[%s790_s15 + $0x68] sm:$0xff]  ;;  %v212_v32 = vld [vmem:[%s790_s15 + $0x70] sm:$0xff]  ;;  %p569_p11 = pnand %p568_p8, %p1004_p9  ;;  %s571_s28 = sshll.u32 %s654_s27, 4  ;;  %s572_s28 = int_to_ptr.vmem [resolvable:$false] %s571_s28 }
  0x40   : > { %304 = vst [vmem:[%s833_s21] sm:$0xff] %v272_v13  ;;  %v278_v29 = vadd.f32 %v805_v2, %v241_v16  ;;  %v243_v30 = vmul.f32 %v800_v1, %v206_v18  ;;  %v213_v33 = vld [vmem:[%s790_s15 + $0x78] sm:$0xff]  ;;  %305 = vst [vmem:[%s833_s21 + $0x8] sm:$0xff] %v273_v20  ;;  %v244_v35 = vmul.f32 %v800_v1, %v207_v19  ;;  %v214_v38 = vld [vmem:[%s790_s15 + $0x80] sm:$0xff]  ;;  %s573_s29 = scalar_lea.vmem %s572_s28, 8192  ;;  %p574_p6 = scmp.lt.s32.totalorder %s937_s18, %s572_s28 }
  0x41   : > { %306 = vst [vmem:[%s833_s21 + $0x10] sm:$0xff] %v274_v21  ;;  %307 = vst [vmem:[%s833_s21 + $0x18] sm:$0xff] %v275_v22  ;;  %v279_v34 = vadd.f32 %v805_v2, %v242_v23  ;;  %v245_v36 = vmul.f32 %v800_v1, %v208_v24  ;;  %v246_v37 = vmul.f32 %v800_v1, %v209_v25  ;;  %v215_v43 = vld [vmem:[%s790_s15 + $0x88] sm:$0xff]  ;;  %v216_v44 = vld [vmem:[%s790_s15 + $0x90] sm:$0xff]  ;;  %p570_p0 = pneg %p569_p11  ;;  %p575_p13 = scmp.lt.s32.totalorder %s573_s29, %s567_s26 }
  0x42   : > { %308 = vst [vmem:[%s833_s21 + $0x20] sm:$0xff] %v276_v27  ;;  %309 = vst [vmem:[%s833_s21 + $0x28] sm:$0xff] %v277_v28  ;;  %v280_v39 = vadd.f32 %v805_v2, %v243_v30  ;;  %v247_v40 = vmul.f32 %v800_v1, %v210_v26  ;;  %v248_v41 = vmul.f32 %v800_v1, %v211_v31  ;;  %v217_v45 = vld [vmem:[%s790_s15 + $0x98] sm:$0xff]  ;;  %v218_v50 = vld [vmem:[%s790_s15 + $0xa0] sm:$0xff] }
  0x43   : > { %310 = vst [vmem:[%s833_s21 + $0x30] sm:$0xff] %v278_v29  ;;  %v249_v42 = vmul.f32 %v800_v1, %v212_v32  ;;  %311 = vst [vmem:[%s833_s21 + $0x38] sm:$0xff] %v279_v34  ;;  %v281_v46 = vadd.f32 %v805_v2, %v244_v35  ;;  %v282_v47 = vadd.f32 %v805_v2, %v245_v36  ;;  %v219_v51 = vld [vmem:[%s790_s15 + $0xa8] sm:$0xff]  ;;  %v220_v52 = vld [vmem:[%s790_s15 + $0xb0] sm:$0xff]  ;;  %p576_p2 = por %p575_p13, %p574_p6 }
  0x44   : > { %v283_v48 = vadd.f32 %v805_v2, %v246_v37  ;;  %v250_v49 = vmul.f32 %v800_v1, %v213_v33  ;;  %312 = vst [vmem:[%s833_s21 + $0x40] sm:$0xff] %v280_v39  ;;  %v284_v53 = vadd.f32 %v805_v2, %v247_v40  ;;  %v285_v54 = vadd.f32 %v805_v2, %v248_v41  ;;  %v221_v57 = vld [vmem:[%s790_s15 + $0xb8] sm:$0xff]  ;;  %v222_v62 = vld [vmem:[%s790_s15 + $0xc0] sm:$0xff]  ;;  %v223_v5 = vld [vmem:[%s790_s15 + $0xc8] sm:$0xff] }
  0x45   : > { %v286_v55 = vadd.f32 %v805_v2, %v249_v42  ;;  %v251_v56 = vmul.f32 %v800_v1, %v214_v38  ;;  %313 = vst [vmem:[%s833_s21 + $0x48] sm:$0xff] %v281_v46  ;;  %314 = vst [vmem:[%s833_s21 + $0x50] sm:$0xff] %v282_v47  ;;  %v252_v59 = vmul.f32 %v800_v1, %v215_v43  ;;  %v224_v6 = vld [vmem:[%s790_s15 + $0xd0] sm:$0xff]  ;;  %v225_v7 = vld [vmem:[%s790_s15 + $0xd8] sm:$0xff]  ;;  %p577_p5 = pnand %p576_p2, %p570_p0 }
  0x46   : > { %315 = vst [vmem:[%s833_s21 + $0x58] sm:$0xff] %v283_v48  ;;  %v287_v58 = vadd.f32 %v805_v2, %v250_v49  ;;  %v253_v60 = vmul.f32 %v800_v1, %v216_v44  ;;  %v254_v61 = vmul.f32 %v800_v1, %v217_v45  ;;  %316 = vst [vmem:[%s833_s21 + $0x60] sm:$0xff] %v284_v53  ;;  %v226_v12 = vld [vmem:[%s790_s15 + $0xe0] sm:$0xff]  ;;  %v227_v13 = vld [vmem:[%s790_s15 + $0xe8] sm:$0xff] }
  0x47   : > { %317 = vst [vmem:[%s833_s21 + $0x68] sm:$0xff] %v285_v54  ;;  %318 = vst [vmem:[%s833_s21 + $0x70] sm:$0xff] %v286_v55  ;;  %v288_v63 = vadd.f32 %v805_v2, %v251_v56  ;;  %v255_v0 = vmul.f32 %v800_v1, %v218_v50  ;;  %v256_v3 = vmul.f32 %v800_v1, %v219_v51  ;;  %v228_v14 = vld [vmem:[%s790_s15 + $0xf0] sm:$0xff]  ;;  %v229_v19 = vld [vmem:[%s790_s15 + $0xf8] sm:$0xff] }
  0x48   : > { %v257_v4 = vmul.f32 %v800_v1, %v220_v52  ;;  %319 = vst [vmem:[%s833_s21 + $0x78] sm:$0xff] %v287_v58  ;;  %v289_v8 = vadd.f32 %v805_v2, %v252_v59  ;;  %v290_v9 = vadd.f32 %v805_v2, %v253_v60  ;;  %v291_v10 = vadd.f32 %v805_v2, %v254_v61 }
  0x49   : > { %v258_v11 = vmul.f32 %v800_v1, %v221_v57  ;;  %320 = vst [vmem:[%s833_s21 + $0x80] sm:$0xff] %v288_v63  ;;  %v292_v15 = vadd.f32 %v805_v2, %v255_v0  ;;  %v293_v16 = vadd.f32 %v805_v2, %v256_v3  ;;  %v259_v18 = vmul.f32 %v800_v1, %v222_v62 }
  0x4a   : > { %v294_v17 = vadd.f32 %v805_v2, %v257_v4  ;;  %321 = vst [vmem:[%s833_s21 + $0x88] sm:$0xff] %v289_v8  ;;  %322 = vst [vmem:[%s833_s21 + $0x90] sm:$0xff] %v290_v9  ;;  %v260_v21 = vmul.f32 %v800_v1, %v223_v5  ;;  %v261_v22 = vmul.f32 %v800_v1, %v224_v6 }
  0x4b   : > { %323 = vst [vmem:[%s833_s21 + $0x98] sm:$0xff] %v291_v10  ;;  %v295_v20 = vadd.f32 %v805_v2, %v258_v11  ;;  %v262_v23 = vmul.f32 %v800_v1, %v225_v7  ;;  %324 = vst [vmem:[%s833_s21 + $0xa0] sm:$0xff] %v292_v15  ;;  %v296_v24 = vadd.f32 %v805_v2, %v259_v18 }
  0x4c   : > { %325 = vst [vmem:[%s833_s21 + $0xa8] sm:$0xff] %v293_v16  ;;  %326 = vst [vmem:[%s833_s21 + $0xb0] sm:$0xff] %v294_v17  ;;  %v263_v25 = vmul.f32 %v800_v1, %v226_v12  ;;  %v264_v26 = vmul.f32 %v800_v1, %v227_v13  ;;  %v265_v27 = vmul.f32 %v800_v1, %v228_v14 }
  0x4d   : > { %327 = vst [vmem:[%s833_s21 + $0xb8] sm:$0xff] %v295_v20  ;;  %v297_v28 = vadd.f32 %v805_v2, %v260_v21  ;;  %v298_v29 = vadd.f32 %v805_v2, %v261_v22  ;;  %v299_v30 = vadd.f32 %v805_v2, %v262_v23  ;;  %v266_v31 = vmul.f32 %v800_v1, %v229_v19 }
  0x4e   : > { %328 = vst [vmem:[%s833_s21 + $0xc0] sm:$0xff] %v296_v24  ;;  %v300_v32 = vadd.f32 %v805_v2, %v263_v25  ;;  %v301_v33 = vadd.f32 %v805_v2, %v264_v26  ;;  %v302_v34 = vadd.f32 %v805_v2, %v265_v27 }
  0x4f   : > { %329 = vst [vmem:[%s833_s21 + $0xc8] sm:$0xff] %v297_v28  ;;  %330 = vst [vmem:[%s833_s21 + $0xd0] sm:$0xff] %v298_v29  ;;  %v303_v1 = vadd.f32 %v805_v2, %v266_v31 }
  0x50   : > { %331 = vst [vmem:[%s833_s21 + $0xd8] sm:$0xff] %v299_v30  ;;  %332 = vst [vmem:[%s833_s21 + $0xe0] sm:$0xff] %v300_v32 }
  0x51   : > { %333 = vst [vmem:[%s833_s21 + $0xe8] sm:$0xff] %v301_v33  ;;  %334 = vst [vmem:[%s833_s21 + $0xf0] sm:$0xff] %v302_v34 }
  0x52   : > { %335 = vst [vmem:[%s833_s21 + $0xf8] sm:$0xff] %v303_v1 }
  0x53   : > { %580 = shalt.err (!%p577_p5)
}
  0x54   : > { %s581_s7 = scalar_lea.hbm %s935_s20, 4096  ;;  %s585_s30 = scalar_lea.hbm %s996_s2, 8192 }
  0x55   : > { %p582_p4 = scmp.ne.s32.totalorder %s935_s20, %s581_s7  ;;  %p586_p12 = scmp.lt.u32.totalorder %s935_s20, %s996_s2 }
  0x56   : > { %p587_p1 = scmp.lt.u32.totalorder %s585_s30, %s581_s7  ;;  %p589_p8 = scmp.lt.u32.totalorder %s581_s7, %s935_s20 }
  0x57   : > { %p583_p7 = pnand %p582_p4, %p1004_p9 }
  0x58   : > { %p588_p3 = por %p587_p1, %p586_p12 }
  0x59   : > { %p584_p10 = pneg %p583_p7 }
  0x5a   : > { %p590_p11 = por %p589_p8, %p588_p3 }
  0x5c   : > { %p591_p0 = pnand %p590_p11, %p584_p10 }
  0x5e   : > { %594 = shalt.err (!%p591_p0)
}
  0x5f   : > { %s655_s6 = smov 128   ;;  %s656_s21 = smov 8  }
  0x60   : > { %473 = dma.vmem_to_hbm [thread:$0]  (%p1004_p9), %s937_s18, 4096, %s935_s20, %s337_s25, %s655_s6, %s655_s6, %s656_s21  }
  0x61 PF: > { %s366_s16 = sand.u32 1, %s629_s9   ;;  %p1005_p6 = scmp.ne.s32.totalorder %s1001_s24, 0 }
  0x62   : > { %p1006_p13 = scmp.ge.s32.totalorder %s649_s14, 2  ;;  %s367_s12 = scalar_lea.sflag [#allocation4], %s366_s16 }
  0x64   : > { %p480_p2 = pnand %p1006_p13, %p1005_p6 }
  0x66   : > { %624 = dma.done.wait (!%p480_p2), %s367_s12, 4096  }
  0x67   : > { %626 = vsyncadd (!%p480_p2), %s367_s12, 4294963200  ;;  %s18_s14 = sadd.s32 1, %s649_s14   ;;  %s1007_s9 = smov %s633_s10 }
  0x68   : > { %p15_p5 = scmp.ge.s32.totalorder %s18_s14, 4   ;;  %s1008_s10 = smov %s637_s11 }
  0x69   : > { %s1009_s11 = smov %s728_s23  ;;  %s1010_s12 = smov %s645_s13 }
  0x6a   : > { %s1011_s13 = smov %s1013_s17  ;;  %17 = sbr.rel (!%p15_p5) target bundleno = 6 (0x6), region = 76 }
  0x71   :  { %372 = vsyncpa [#allocation3], 1 }
  0x72   :  { %374 = vsyncpa [#allocation3 + $0x1], 1 }
  0x73   :  { %375 = vsyncpa [#allocation4], 1 }
  0x74   :  { %377 = vsyncpa [#allocation4 + $0x1], 1 }

</bundles_post_ra>
